<compile_context>
chip_gen: v7x
topology: tpu7x:2x2x1
jax: 0.10.0
libtpu: 0.0.40
codegen_flags: <defaults>
</compile_context>

<pallas_src>
import jax
import jax.numpy as jnp
from jax.experimental import pallas as pl
from jax.experimental.pallas import tpu as pltpu


# ------------------------------- Pallas kernel ------------------------------

def gcnso_kernel(a_ref, x_ref, pa_ref, pool_ref,
                 wr1_ref, ws1_ref, b1_ref,
                 wr2_ref, ws2_ref, b2_ref,
                 wl_ref, bl_ref,
                 out_ref, s1_ref, s2_ref):
    i = pl.program_id(0)
    tm = a_ref.shape[0]                      # rows of A handled this step

    @pl.when(i == 0)
    def _():
        s1_ref[...] = jnp.zeros_like(s1_ref)   # accumulates (pool@A) @ h1
        s2_ref[...] = jnp.zeros_like(s2_ref)   # accumulates  pool     @ h1

    # Rows of x belonging to this tile (x is fully resident in VMEM).
    row0 = pl.multiple_of(i * tm, 8)
    x_rows = x_ref[pl.ds(row0, tm), :]

    # ---- conv1 (GraphConv) + ReLU, aggregate-first order -------------------
    # agg = A[rows, :] @ x         (bf16 operands, f32 accumulation on MXU)
    agg = jnp.dot(a_ref[...], x_ref[...].astype(jnp.bfloat16),
                  preferred_element_type=jnp.float32)
    h1 = jnp.dot(agg, wr1_ref[...], preferred_element_type=jnp.float32)
    h1 = h1 + jnp.dot(x_rows, ws1_ref[...], preferred_element_type=jnp.float32)
    h1 = h1 + b1_ref[...]
    h1 = jnp.maximum(h1, 0.0)                # ReLU in f32

    # ---- conv2 fused with global_mean_pool (accumulated over row tiles) ----
    s1_ref[...] += jnp.dot(pa_ref[...], h1, preferred_element_type=jnp.float32)
    s2_ref[...] += jnp.dot(pool_ref[...], h1, preferred_element_type=jnp.float32)

    @pl.when(i == pl.num_programs(0) - 1)
    def _():
        # pool @ conv2(h1) ;  pool rows sum to 1 so the bias passes through.
        g = (jnp.dot(s1_ref[...], wr2_ref[...], preferred_element_type=jnp.float32)
             + jnp.dot(s2_ref[...], ws2_ref[...], preferred_element_type=jnp.float32)
             + b2_ref[...])
        # F.dropout(p=0.5) is identity in eval mode (training=False).
        out_ref[...] = (jnp.dot(g, wl_ref[...], preferred_element_type=jnp.float32)
                        + bl_ref[...])


# --------------------------------- wrapper ----------------------------------

def _round_up(v, m):
    return ((v + m - 1) // m) * m


def gcnso_forward(a, x, pool, params):
    (wr1, ws1, b1, wr2, ws2, b2, wl, bl) = params
    n, f = x.shape
    g = pool.shape[0]
    h = wr1.shape[1]
    c = wl.shape[1]

    # Row-tile size: the (G, tm) pool/PA blocks need tm % 128 == 0 unless
    # tm equals the full (padded) N, so small graphs use one full-width tile.
    if n <= 128:
        tm = _round_up(n, 8)
        n_pad = tm
    else:
        tm = 512 if n >= 2048 else (256 if n >= 512 else 128)
        n_pad = _round_up(n, tm)
    pad = n_pad - n

    # Zero-pad: padded nodes have no edges and zero pool weight, so they
    # contribute nothing (their h1 rows are multiplied by zero pool columns).
    a_p = jnp.pad(a, ((0, pad), (0, pad)))
    x_p = jnp.pad(x, ((0, pad), (0, 0)))
    pool_p = jnp.pad(pool, ((0, 0), (0, pad)))
    pa_p = pool_p @ a_p                      # (G, N_pad) f32: fuses pool into conv2
    a_bf16 = a_p.astype(jnp.bfloat16)        # 0/1 adjacency is exact in bf16

    grid = (n_pad // tm,)

    # Resident-set estimate (double-buffered tiles + weights + scratch).
    vmem_bytes = (2 * tm * n_pad * 2            # A row tile (bf16), double-buffered
                  + 2 * n_pad * f * 4           # x (resident)
                  + 2 * 2 * g * tm * 4          # pool@A and pool column tiles
                  + 2 * (2 * f * h + 2 * h * h + h * c + 2 * h + c) * 4
                  + 2 * g * c * 4               # output block
                  + 2 * g * h * 4)              # scratch accumulators
    vmem_limit = int(min(vmem_bytes + (4 << 20), 128 << 20))

    flops = 2.0 * (n_pad * n_pad * f            # A @ x
                   + 2.0 * n_pad * f * h        # (A@x)@W_rel1, x@W_root1
                   + 2.0 * g * n_pad * h        # (pool@A)@h1, pool@h1
                   + 2.0 * g * h * h            # S1@W_rel2, S2@W_root2
                   + g * h * c)                 # final linear
    bytes_accessed = (n_pad * n_pad * 2 + n_pad * f * 4 + 2 * g * n_pad * 4
                      + (2 * f * h + 2 * h * h + h * c + 2 * h + c) * 4
                      + g * c * 4)
    cost = pl.CostEstimate(flops=int(flops), transcendentals=0,
                           bytes_accessed=int(bytes_accessed))

    return pl.pallas_call(
        gcnso_kernel,
        out_shape=jax.ShapeDtypeStruct((g, c), jnp.float32),
        grid_spec=pltpu.PrefetchScalarGridSpec(
            num_scalar_prefetch=0,
            grid=grid,
            in_specs=[
                pl.BlockSpec((tm, n_pad), lambda i: (i, 0)),   # A row tile (bf16)
                pl.BlockSpec((n_pad, f), lambda i: (0, 0)),    # x, resident
                pl.BlockSpec((g, tm), lambda i: (0, i)),       # pool@A column tile
                pl.BlockSpec((g, tm), lambda i: (0, i)),       # pool column tile
                pl.BlockSpec((f, h), lambda i: (0, 0)),        # W_rel1
                pl.BlockSpec((f, h), lambda i: (0, 0)),        # W_root1
                pl.BlockSpec((1, h), lambda i: (0, 0)),        # b1
                pl.BlockSpec((h, h), lambda i: (0, 0)),        # W_rel2
                pl.BlockSpec((h, h), lambda i: (0, 0)),        # W_root2
                pl.BlockSpec((1, h), lambda i: (0, 0)),        # b2
                pl.BlockSpec((h, c), lambda i: (0, 0)),        # W_lin
                pl.BlockSpec((1, c), lambda i: (0, 0)),        # b_lin
            ],
            out_specs=pl.BlockSpec((g, c), lambda i: (0, 0)),
            scratch_shapes=[pltpu.VMEM((g, h), jnp.float32),
                            pltpu.VMEM((g, h), jnp.float32)],
        ),
        compiler_params=pltpu.CompilerParams(
            # The single grid axis carries the pooled-sum reduction (scratch
            # accumulators + resident output), so it must be "arbitrary".
            dimension_semantics=("arbitrary",),
            vmem_limit_bytes=vmem_limit,
        ),
        cost_estimate=cost,
    )(a_bf16, x_p, pa_p, pool_p, wr1, ws1, b1, wr2, ws2, b2, wl, bl)


# ----------------------------- plain-JAX glue --------------------------------

def build_adj(edge_index, num_nodes):
    """Dense unnormalized adjacency used by GraphConv: A[dst, src] = 1."""
    src, dst = edge_index
    adj = jnp.zeros((num_nodes, num_nodes), jnp.float32)
    return adj.at[dst, src].set(1.0)


def build_pool_matrix(batch, num_graphs, num_nodes):
    """(G, N) matrix whose rows average the nodes of each graph."""
    onehot = (batch[None, :] == jnp.arange(num_graphs)[:, None]).astype(jnp.float32)
    counts = jnp.maximum(jnp.sum(onehot, axis=1, keepdims=True), 1.0)
    return onehot / counts


def glorot(key, shape):
    fan_in, fan_out = shape
    limit = jnp.sqrt(6.0 / (fan_in + fan_out))
    return jax.random.uniform(key, shape, jnp.float32, -limit, limit)


def init_params(key, num_features, hidden, num_classes):
    ks = jax.random.split(key, 8)
    w_rel1 = glorot(ks[0], (num_features, hidden))
    w_root1 = glorot(ks[1], (num_features, hidden))
    b1 = jax.random.uniform(ks[2], (1, hidden), jnp.float32, -0.1, 0.1)
    w_rel2 = glorot(ks[3], (hidden, hidden))
    w_root2 = glorot(ks[4], (hidden, hidden))
    b2 = jax.random.uniform(ks[5], (1, hidden), jnp.float32, -0.1, 0.1)
    wl = glorot(ks[6], (hidden, num_classes))
    bl = jax.random.uniform(ks[7], (1, num_classes), jnp.float32, -0.1, 0.1)
    return (w_rel1, w_root1, b1, w_rel2, w_root2, b2, wl, bl)


def gcnso_reference(a, x, pool, params):
    """Pure-JAX f32 reference of GCNso.forward (eval mode)."""
    (wr1, ws1, b1, wr2, ws2, b2, wl, bl) = params
    h = jnp.maximum((a @ x) @ wr1 + x @ ws1 + b1, 0.0)   # conv1 + relu
    h = (a @ h) @ wr2 + h @ ws2 + b2                      # conv2
    gp = pool @ h                                         # global_mean_pool
    return gp @ wl + bl                                   # dropout(identity) + lin


if __name__ == "__main__":
    key = jax.random.PRNGKey(0)

    num_graphs = 4
    nodes_per_graph = 64
    num_nodes = num_graphs * nodes_per_graph   # 256 -> row tile 128, grid (2,)
    num_features = 8
    hidden_channels = 32
    num_classes = 4

    # Undirected ring inside each graph.
    src_list, dst_list = [], []
    for gph in range(num_graphs):
        base = gph * nodes_per_graph
        for i in range(nodes_per_graph):
            u, v = base + i, base + (i + 1) % nodes_per_graph
            src_list += [u, v]
            dst_list += [v, u]
    edge_index = jnp.array([src_list, dst_list], dtype=jnp.int32)
    batch = jnp.repeat(jnp.arange(num_graphs, dtype=jnp.int32), nodes_per_graph)

    kx, kp = jax.random.split(key)
    x = jax.random.normal(kx, (num_nodes, num_features), jnp.float32)
    params = init_params(kp, num_features, hidden_channels, num_classes)

    a = build_adj(edge_index, num_nodes)
    pool = build_pool_matrix(batch, num_graphs, num_nodes)

    out = gcnso_forward(a, x, pool, params)
    jax.block_until_ready(out)
    assert out.shape == (num_graphs, num_classes)

    ref = gcnso_reference(a, x, pool, params)
    err = float(jnp.max(jnp.abs(out - ref)))
    scale = float(jnp.max(jnp.abs(ref))) + 1e-6
    assert err <= 3e-2 * scale + 3e-3, f"mismatch: max abs err {err}, scale {scale}"
    print("KERNEL_OK")
</pallas_src>

<mosaic_0001>
module attributes {stable_mosaic.version = 11 : i64} {
  func.func @gcnso_kernel(%arg0: i32, %arg1: memref<128x256xbf16, #tpu.memory_space<vmem>>, %arg2: memref<256x8xf32, #tpu.memory_space<vmem>>, %arg3: memref<4x128xf32, #tpu.memory_space<vmem>>, %arg4: memref<4x128xf32, #tpu.memory_space<vmem>>, %arg5: memref<8x32xf32, #tpu.memory_space<vmem>>, %arg6: memref<8x32xf32, #tpu.memory_space<vmem>>, %arg7: memref<1x32xf32, #tpu.memory_space<vmem>>, %arg8: memref<32x32xf32, #tpu.memory_space<vmem>>, %arg9: memref<32x32xf32, #tpu.memory_space<vmem>>, %arg10: memref<1x32xf32, #tpu.memory_space<vmem>>, %arg11: memref<32x4xf32, #tpu.memory_space<vmem>>, %arg12: memref<1x4xf32, #tpu.memory_space<vmem>>, %arg13: memref<4x4xf32, #tpu.memory_space<vmem>>, %arg14: memref<4x32xf32, #tpu.memory_space<vmem>>, %arg15: memref<4x32xf32, #tpu.memory_space<vmem>>) attributes {dimension_semantics = [#tpu.dimension_semantics<arbitrary>], iteration_bounds = array<i64: 2>, scalar_prefetch = 0 : i64, scratch_operands = 2 : i64, tpu.core_type = #tpu.core_type<tc>, window_params = [{transform_indices = @transform_0, window_bounds = array<i64: 128, 256>}, {pipeline_mode = #tpu.pipeline_mode<synchronous>, transform_indices = @transform_1, window_bounds = array<i64: 256, 8>}, {transform_indices = @transform_2, window_bounds = array<i64: 4, 128>}, {transform_indices = @transform_3, window_bounds = array<i64: 4, 128>}, {pipeline_mode = #tpu.pipeline_mode<synchronous>, transform_indices = @transform_4, window_bounds = array<i64: 8, 32>}, {pipeline_mode = #tpu.pipeline_mode<synchronous>, transform_indices = @transform_5, window_bounds = array<i64: 8, 32>}, {pipeline_mode = #tpu.pipeline_mode<synchronous>, transform_indices = @transform_6, window_bounds = array<i64: 1, 32>}, {pipeline_mode = #tpu.pipeline_mode<synchronous>, transform_indices = @transform_7, window_bounds = array<i64: 32, 32>}, {pipeline_mode = #tpu.pipeline_mode<synchronous>, transform_indices = @transform_8, window_bounds = array<i64: 32, 32>}, {pipeline_mode = #tpu.pipeline_mode<synchronous>, transform_indices = @transform_9, window_bounds = array<i64: 1, 32>}, {pipeline_mode = #tpu.pipeline_mode<synchronous>, transform_indices = @transform_10, window_bounds = array<i64: 32, 4>}, {pipeline_mode = #tpu.pipeline_mode<synchronous>, transform_indices = @transform_11, window_bounds = array<i64: 1, 4>}, {pipeline_mode = #tpu.pipeline_mode<synchronous>, transform_indices = @transform_12, window_bounds = array<i64: 4, 4>}]} {
    %c0_i32 = arith.constant 0 : i32
    %0 = arith.cmpi eq, %arg0, %c0_i32 : i32
    %1 = arith.extui %0 : i1 to i32
    %c0_i32_0 = arith.constant 0 : i32
    %2 = arith.cmpi ne, %1, %c0_i32_0 : i32
    scf.if %2 {
      %cst_29 = arith.constant 0.000000e+00 : f32
      %34 = vector.broadcast %cst_29 : f32 to vector<4x32xf32>
      %c0_30 = arith.constant 0 : index
      %c0_31 = arith.constant 0 : index
      %35 = vector.load %arg14[%c0_30, %c0_31] : memref<4x32xf32, #tpu.memory_space<vmem>>, vector<4x32xf32>
      tpu.vector_store %arg14[%c0_30, %c0_31], %34 {strides = array<i32>} : memref<4x32xf32, #tpu.memory_space<vmem>>, vector<4x32xf32>,
      %cst_32 = arith.constant 0.000000e+00 : f32
      %36 = vector.broadcast %cst_32 : f32 to vector<4x32xf32>
      %c0_33 = arith.constant 0 : index
      %c0_34 = arith.constant 0 : index
      %37 = vector.load %arg15[%c0_33, %c0_34] : memref<4x32xf32, #tpu.memory_space<vmem>>, vector<4x32xf32>
      tpu.vector_store %arg15[%c0_33, %c0_34], %36 {strides = array<i32>} : memref<4x32xf32, #tpu.memory_space<vmem>>, vector<4x32xf32>,
    } else {
    }
    %c128_i32 = arith.constant 128 : i32
    %3 = arith.muli %arg0, %c128_i32 : i32
    %4 = tpu.assume_multiple %3, 8 : i32
    %5 = arith.index_cast %4 : i32 to index
    %c0 = arith.constant 0 : index
    %6 = vector.load %arg2[%5, %c0] : memref<256x8xf32, #tpu.memory_space<vmem>>, vector<128x8xf32>
    %c0_1 = arith.constant 0 : index
    %c0_2 = arith.constant 0 : index
    %7 = vector.load %arg1[%c0_1, %c0_2] : memref<128x256xbf16, #tpu.memory_space<vmem>>, vector<128x256xbf16>
    %c0_3 = arith.constant 0 : index
    %c0_4 = arith.constant 0 : index
    %8 = vector.load %arg2[%c0_3, %c0_4] : memref<256x8xf32, #tpu.memory_space<vmem>>, vector<256x8xf32>
    %9 = arith.truncf %8 : vector<256x8xf32> to vector<256x8xbf16>
    %cst = arith.constant dense<0.000000e+00> : vector<128x8xf32>
    %10 = tpu.matmul %7, %9, %cst {dimension_numbers = #tpu.dot_dimension_numbers<[1], [0], [0], [1], [0, 0, 1, 1], [], []>} : vector<128x256xbf16>, vector<256x8xbf16>, vector<128x8xf32> -> vector<128x8xf32>
    %c0_5 = arith.constant 0 : index
    %c0_6 = arith.constant 0 : index
    %11 = vector.load %arg5[%c0_5, %c0_6] : memref<8x32xf32, #tpu.memory_space<vmem>>, vector<8x32xf32>
    %cst_7 = arith.constant dense<0.000000e+00> : vector<128x32xf32>
    %12 = tpu.matmul %10, %11, %cst_7 {dimension_numbers = #tpu.dot_dimension_numbers<[1], [0], [0], [1], [0, 0, 1, 1], [], []>} : vector<128x8xf32>, vector<8x32xf32>, vector<128x32xf32> -> vector<128x32xf32>
    %c0_8 = arith.constant 0 : index
    %c0_9 = arith.constant 0 : index
    %13 = vector.load %arg6[%c0_8, %c0_9] : memref<8x32xf32, #tpu.memory_space<vmem>>, vector<8x32xf32>
    %cst_10 = arith.constant dense<0.000000e+00> : vector<128x32xf32>
    %14 = tpu.matmul %6, %13, %cst_10 {dimension_numbers = #tpu.dot_dimension_numbers<[1], [0], [0], [1], [0, 0, 1, 1], [], []>} : vector<128x8xf32>, vector<8x32xf32>, vector<128x32xf32> -> vector<128x32xf32>
    %15 = arith.addf %12, %14 : vector<128x32xf32>
    %c0_11 = arith.constant 0 : index
    %c0_12 = arith.constant 0 : index
    %16 = vector.load %arg7[%c0_11, %c0_12] : memref<1x32xf32, #tpu.memory_space<vmem>>, vector<1x32xf32>
    %17 = vector.broadcast %16 : vector<1x32xf32> to vector<128x32xf32>
    %18 = arith.addf %15, %17 : vector<128x32xf32>
    %cst_13 = arith.constant 0.000000e+00 : f32
    %19 = vector.broadcast %cst_13 : f32 to vector<128x32xf32>
    %20 = arith.maximumf %18, %19 : vector<128x32xf32>
    %c0_14 = arith.constant 0 : index
    %c0_15 = arith.constant 0 : index
    %21 = vector.load %arg14[%c0_14, %c0_15] : memref<4x32xf32, #tpu.memory_space<vmem>>, vector<4x32xf32>
    %c0_16 = arith.constant 0 : index
    %c0_17 = arith.constant 0 : index
    %22 = vector.load %arg3[%c0_16, %c0_17] : memref<4x128xf32, #tpu.memory_space<vmem>>, vector<4x128xf32>
    %cst_18 = arith.constant dense<0.000000e+00> : vector<4x32xf32>
    %23 = tpu.matmul %22, %20, %cst_18 {dimension_numbers = #tpu.dot_dimension_numbers<[1], [0], [0], [1], [0, 0, 1, 1], [], []>} : vector<4x128xf32>, vector<128x32xf32>, vector<4x32xf32> -> vector<4x32xf32>
    %24 = arith.addf %21, %23 : vector<4x32xf32>
    %c0_19 = arith.constant 0 : index
    %c0_20 = arith.constant 0 : index
    %25 = vector.load %arg14[%c0_19, %c0_20] : memref<4x32xf32, #tpu.memory_space<vmem>>, vector<4x32xf32>
    tpu.vector_store %arg14[%c0_19, %c0_20], %24 {strides = array<i32>} : memref<4x32xf32, #tpu.memory_space<vmem>>, vector<4x32xf32>,
    %c0_21 = arith.constant 0 : index
    %c0_22 = arith.constant 0 : index
    %26 = vector.load %arg15[%c0_21, %c0_22] : memref<4x32xf32, #tpu.memory_space<vmem>>, vector<4x32xf32>
    %c0_23 = arith.constant 0 : index
    %c0_24 = arith.constant 0 : index
    %27 = vector.load %arg4[%c0_23, %c0_24] : memref<4x128xf32, #tpu.memory_space<vmem>>, vector<4x128xf32>
    %cst_25 = arith.constant dense<0.000000e+00> : vector<4x32xf32>
    %28 = tpu.matmul %27, %20, %cst_25 {dimension_numbers = #tpu.dot_dimension_numbers<[1], [0], [0], [1], [0, 0, 1, 1], [], []>} : vector<4x128xf32>, vector<128x32xf32>, vector<4x32xf32> -> vector<4x32xf32>
    %29 = arith.addf %26, %28 : vector<4x32xf32>
    %c0_26 = arith.constant 0 : index
    %c0_27 = arith.constant 0 : index
    %30 = vector.load %arg15[%c0_26, %c0_27] : memref<4x32xf32, #tpu.memory_space<vmem>>, vector<4x32xf32>
    tpu.vector_store %arg15[%c0_26, %c0_27], %29 {strides = array<i32>} : memref<4x32xf32, #tpu.memory_space<vmem>>, vector<4x32xf32>,
    %c1_i32 = arith.constant 1 : i32
    %31 = arith.cmpi eq, %arg0, %c1_i32 : i32
    %32 = arith.extui %31 : i1 to i32
    %c0_i32_28 = arith.constant 0 : i32
    %33 = arith.cmpi ne, %32, %c0_i32_28 : i32
    scf.if %33 {
      %c0_29 = arith.constant 0 : index
      %c0_30 = arith.constant 0 : index
      %34 = vector.load %arg14[%c0_29, %c0_30] : memref<4x32xf32, #tpu.memory_space<vmem>>, vector<4x32xf32>
      %c0_31 = arith.constant 0 : index
      %c0_32 = arith.constant 0 : index
      %35 = vector.load %arg8[%c0_31, %c0_32] : memref<32x32xf32, #tpu.memory_space<vmem>>, vector<32x32xf32>
      %cst_33 = arith.constant dense<0.000000e+00> : vector<4x32xf32>
      %36 = tpu.matmul %34, %35, %cst_33 {dimension_numbers = #tpu.dot_dimension_numbers<[1], [0], [0], [1], [0, 0, 1, 1], [], []>} : vector<4x32xf32>, vector<32x32xf32>, vector<4x32xf32> -> vector<4x32xf32>
      %c0_34 = arith.constant 0 : index
      %c0_35 = arith.constant 0 : index
      %37 = vector.load %arg15[%c0_34, %c0_35] : memref<4x32xf32, #tpu.memory_space<vmem>>, vector<4x32xf32>
      %c0_36 = arith.constant 0 : index
      %c0_37 = arith.constant 0 : index
      %38 = vector.load %arg9[%c0_36, %c0_37] : memref<32x32xf32, #tpu.memory_space<vmem>>, vector<32x32xf32>
      %cst_38 = arith.constant dense<0.000000e+00> : vector<4x32xf32>
      %39 = tpu.matmul %37, %38, %cst_38 {dimension_numbers = #tpu.dot_dimension_numbers<[1], [0], [0], [1], [0, 0, 1, 1], [], []>} : vector<4x32xf32>, vector<32x32xf32>, vector<4x32xf32> -> vector<4x32xf32>
      %40 = arith.addf %36, %39 : vector<4x32xf32>
      %c0_39 = arith.constant 0 : index
      %c0_40 = arith.constant 0 : index
      %41 = vector.load %arg10[%c0_39, %c0_40] : memref<1x32xf32, #tpu.memory_space<vmem>>, vector<1x32xf32>
      %42 = vector.broadcast %41 : vector<1x32xf32> to vector<4x32xf32>
      %43 = arith.addf %40, %42 : vector<4x32xf32>
      %c0_41 = arith.constant 0 : index
      %c0_42 = arith.constant 0 : index
      %44 = vector.load %arg11[%c0_41, %c0_42] : memref<32x4xf32, #tpu.memory_space<vmem>>, vector<32x4xf32>
      %cst_43 = arith.constant dense<0.000000e+00> : vector<4x4xf32>
      %45 = tpu.matmul %43, %44, %cst_43 {dimension_numbers = #tpu.dot_dimension_numbers<[1], [0], [0], [1], [0, 0, 1, 1], [], []>} : vector<4x32xf32>, vector<32x4xf32>, vector<4x4xf32> -> vector<4x4xf32>
      %c0_44 = arith.constant 0 : index
      %c0_45 = arith.constant 0 : index
      %46 = vector.load %arg12[%c0_44, %c0_45] : memref<1x4xf32, #tpu.memory_space<vmem>>, vector<1x4xf32>
      %47 = vector.broadcast %46 : vector<1x4xf32> to vector<4x4xf32>
      %48 = arith.addf %45, %47 : vector<4x4xf32>
      %c0_46 = arith.constant 0 : index
      %c0_47 = arith.constant 0 : index
      %49 = vector.load %arg13[%c0_46, %c0_47] : memref<4x4xf32, #tpu.memory_space<vmem>>, vector<4x4xf32>
      tpu.vector_store %arg13[%c0_46, %c0_47], %48 {strides = array<i32>} : memref<4x4xf32, #tpu.memory_space<vmem>>, vector<4x4xf32>,
    } else {
    }
    return
  }
  func.func @transform_0(%arg0: i32) -> (i32, i32) {
    %c0_i32 = arith.constant 0 : i32
    %c0_i32_0 = arith.constant 0 : i32
    return %arg0, %c0_i32 : i32, i32
  }
  func.func @transform_1(%arg0: i32) -> (i32, i32) {
    %c0_i32 = arith.constant 0 : i32
    %c0_i32_0 = arith.constant 0 : i32
    %c0_i32_1 = arith.constant 0 : i32
    return %c0_i32, %c0_i32_0 : i32, i32
  }
  func.func @transform_2(%arg0: i32) -> (i32, i32) {
    %c0_i32 = arith.constant 0 : i32
    %c0_i32_0 = arith.constant 0 : i32
    return %c0_i32, %arg0 : i32, i32
  }
  func.func @transform_3(%arg0: i32) -> (i32, i32) {
    %c0_i32 = arith.constant 0 : i32
    %c0_i32_0 = arith.constant 0 : i32
    return %c0_i32, %arg0 : i32, i32
  }
  func.func @transform_4(%arg0: i32) -> (i32, i32) {
    %c0_i32 = arith.constant 0 : i32
    %c0_i32_0 = arith.constant 0 : i32
    %c0_i32_1 = arith.constant 0 : i32
    return %c0_i32, %c0_i32_0 : i32, i32
  }
  func.func @transform_5(%arg0: i32) -> (i32, i32) {
    %c0_i32 = arith.constant 0 : i32
    %c0_i32_0 = arith.constant 0 : i32
    %c0_i32_1 = arith.constant 0 : i32
    return %c0_i32, %c0_i32_0 : i32, i32
  }
  func.func @transform_6(%arg0: i32) -> (i32, i32) {
    %c0_i32 = arith.constant 0 : i32
    %c0_i32_0 = arith.constant 0 : i32
    %c0_i32_1 = arith.constant 0 : i32
    return %c0_i32, %c0_i32_0 : i32, i32
  }
  func.func @transform_7(%arg0: i32) -> (i32, i32) {
    %c0_i32 = arith.constant 0 : i32
    %c0_i32_0 = arith.constant 0 : i32
    %c0_i32_1 = arith.constant 0 : i32
    return %c0_i32, %c0_i32_0 : i32, i32
  }
  func.func @transform_8(%arg0: i32) -> (i32, i32) {
    %c0_i32 = arith.constant 0 : i32
    %c0_i32_0 = arith.constant 0 : i32
    %c0_i32_1 = arith.constant 0 : i32
    return %c0_i32, %c0_i32_0 : i32, i32
  }
  func.func @transform_9(%arg0: i32) -> (i32, i32) {
    %c0_i32 = arith.constant 0 : i32
    %c0_i32_0 = arith.constant 0 : i32
    %c0_i32_1 = arith.constant 0 : i32
    return %c0_i32, %c0_i32_0 : i32, i32
  }
  func.func @transform_10(%arg0: i32) -> (i32, i32) {
    %c0_i32 = arith.constant 0 : i32
    %c0_i32_0 = arith.constant 0 : i32
    %c0_i32_1 = arith.constant 0 : i32
    return %c0_i32, %c0_i32_0 : i32, i32
  }
  func.func @transform_11(%arg0: i32) -> (i32, i32) {
    %c0_i32 = arith.constant 0 : i32
    %c0_i32_0 = arith.constant 0 : i32
    %c0_i32_1 = arith.constant 0 : i32
    return %c0_i32, %c0_i32_0 : i32, i32
  }
  func.func @transform_12(%arg0: i32) -> (i32, i32) {
    %c0_i32 = arith.constant 0 : i32
    %c0_i32_0 = arith.constant 0 : i32
    %c0_i32_1 = arith.constant 0 : i32
    return %c0_i32, %c0_i32_0 : i32, i32
  }
}

</mosaic_0001>

<bundles_post_ra>
// kernel: tpu_custom_call.1
= control target key start
LH: loop header
LB: loop body
LE: loop exit
PB: predicated region body
PF: predicated region fallthrough
CT: control target
= control target key end

     0   :  { %s3053_s0 = inlined_call_operand.vmem [shape: bf16[256,256], index: 0, kind: input, shape index: {}]   ;;  %s3054_s1 = inlined_call_operand.vmem [shape: f32[256,8], index: 1, kind: input, shape index: {}]   ;;  %s3055_s2 = inlined_call_operand.hbm [shape: f32[4,256], index: 2, kind: input, shape index: {}]   ;;  %s3056_s3 = inlined_call_operand.hbm [shape: f32[4,256], index: 3, kind: input, shape index: {}]   ;;  %s3057_s4 = inlined_call_operand.hbm [shape: f32[8,32], index: 4, kind: input, shape index: {}]   ;;  %s3058_s5 = inlined_call_operand.hbm [shape: f32[8,32], index: 5, kind: input, shape index: {}]   ;;  %s3059_s6 = inlined_call_operand.vmem [shape: f32[1,32], index: 6, kind: input, shape index: {}]   ;;  %s3060_s7 = inlined_call_operand.vmem [shape: f32[32,32], index: 7, kind: input, shape index: {}]   ;;  %s3061_s8 = inlined_call_operand.vmem [shape: f32[32,32], index: 8, kind: input, shape index: {}]   ;;  %s3062_s9 = inlined_call_operand.vmem [shape: f32[1,32], index: 9, kind: input, shape index: {}]   ;;  %s3063_s10 = inlined_call_operand.vmem [shape: f32[32,4], index: 10, kind: input, shape index: {}]   ;;  %s3064_s11 = inlined_call_operand.vmem [shape: f32[1,4], index: 11, kind: input, shape index: {}]   ;;  %s3065_s12 = inlined_call_operand.hbm [shape: f32[4,4], index: 12, kind: output, shape index: {}]  }
   0x1   :  { %3073 = sst [smem:[#allocation21_spill]] %s3057_s4 }
   0x2   :  { %3074 = sst [smem:[#allocation22_spill]] %s3058_s5 }
   0x3   :  { %3075 = sst [smem:[#allocation23_spill]] %s3065_s12 }
   0x4   :  { %17 = vsyncpa [#allocation5], 0 }
   0x5   :  { %19 = vsyncpa [#allocation5 + $0x1], 0 }
   0x6   :  { %20 = vsyncpa [#allocation8], 0 }
   0x7   :  { %22 = vsyncpa [#allocation8 + $0x1], 0 }
   0x8   :  { %23 = vsyncpa [#allocation11], 0 }
   0x9   :  { %24 = vsyncpa [#allocation6], 0  ;;  %s2553_s21 = smov 0   ;;  %s2555_s22 = smov 0  }
   0xa   :  { %s2557_s23 = smov 0   ;;  %s2559_s24 = smov 0  }
   0xb LB: > { %3076 = sst [smem:[#allocation18_spill]] %s2470_s23  ;;  %s2572_s25 = sadd.s32 4294967295, %s2474_s24   ;;  %s2474_s24 = sphi %s2559_s24, %s3094_s24   ;;  %s2470_s23 = sphi %s2557_s23, %s3096_s23   ;;  %s2466_s22 = sphi %s2555_s22, %s3098_s22   ;;  %s2462_s21 = sphi %s2553_s21, %s3097_s21  }
   0xc   : > { %p97_p0 = scmp.ne.s32.totalorder %s2466_s22, %s2462_s21  ;;  %p3066_p1 = scmp.eq.s32.totalorder %s2572_s25, 0 }
   0xd   : > { %p1717_p2 = scmp.ge.s32.totalorder %s2474_s24, 1  ;;  %p323_p3 = scmp.lt.s32.totalorder %s2474_s24, 3 }
   0xe   : > { %p2581_p5 = por %p3066_p1, %p97_p0  ;;  %s2476_s28 = smov [#allocation9]  }
   0xf   : > { %p2585_p6 = pnand %p1717_p2, %p323_p3  ;;  %s339_s29 = sshll.u32 %s2476_s28, 4  ;;  %s340_s29 = int_to_ptr.vmem [resolvable:$true] %s339_s29 }
  0x10   : > { %s3077_s26 = scalar_select %p2581_p5, 1, 0 }
  0x11   : > { %s3078_s27 = scalar_select %p2585_p6, 1, 0 }
  0x12   : > { %p2195_p7 = pneg %p2585_p6  ;;  %s2477_s30 = smov [#allocation10]  }
  0x13   : > { %s350_s13 = sshll.u32 %s2477_s30, 4  ;;  %s2600_s15 = sadd.s32 1, %s2474_s24   ;;  %s2597_s13 = int_to_ptr.vmem [resolvable:$true] %s350_s13 }
  0x14   : > { %p2593_p8 = pnand %p2195_p7, %p3066_p1  ;;  %3080 = sst [smem:[#allocation19_spill]] %s2600_s15 }
  0x15   : > { %s3081_s4 = sld [smem:[#allocation21_spill]] }
  0x16   : > { %p2284_p10 = pneg %p2593_p8 }
  0x1b   : > { %s2282_s19 = scalar_lea.hbm %s3081_s4, 128 }
  0x1c   : > { %p2283_p9 = scmp.ne.s32.totalorder %s3081_s4, %s2282_s19  ;;  %p2289_p13 = scmp.lt.u32.totalorder %s2282_s19, %s3081_s4 }
  0x1e   : > { %p2285_p11 = pnand %p2284_p10, %p2283_p9 }
  0x20   : > { %p2286_p12 = pneg %p2285_p11 }
  0x22   : > { %p2291_p0 = pnand %p2289_p13, %p2286_p12 }
  0x24   : > { %2294 = shalt.err (!%p2291_p0)
}
  0x25   : > { %s2295_s16 = scalar_lea.vmem %s340_s29, 128  ;;  %p2303_p4 = scmp.lt.s32.totalorder %s340_s29, %s340_s29 }
  0x26   : > { %p2296_p2 = scmp.ne.s32.totalorder %s340_s29, %s2295_s16  ;;  %p2304_p1 = scmp.lt.s32.totalorder %s2295_s16, %s2295_s16 }
  0x28   : > { %p2298_p3 = pnand %p2296_p2, %p2284_p10  ;;  %p2305_p5 = por %p2304_p1, %p2303_p4 }
  0x2a   : > { %p2299_p7 = pneg %p2298_p3 }
  0x2c   : > { %p2306_p6 = pnand %p2305_p5, %p2299_p7 }
  0x2e   : > { %2309 = shalt.err (!%p2306_p6)
}
  0x2f   : > { %2198 = dma.hbm_to_vmem [thread:$0]  (!%p2593_p8), %s3081_s4, 128, %s340_s29, [#allocation8]  }
  0x30   : > { %s3082_s5 = sld [smem:[#allocation22_spill]] }
  0x36   : > { %s2310_s21 = scalar_lea.hbm %s3082_s5, 128 }
  0x37   : > { %p2311_p9 = scmp.ne.s32.totalorder %s3082_s5, %s2310_s21  ;;  %p2317_p5 = scmp.lt.u32.totalorder %s2310_s21, %s3082_s5 }
  0x39   : > { %p2313_p1 = pnand %p2311_p9, %p2284_p10 }
  0x3b   : > { %p2314_p4 = pneg %p2313_p1 }
  0x3d   : > { %p2319_p6 = pnand %p2317_p5, %p2314_p4 }
  0x3f   : > { %2322 = shalt.err (!%p2319_p6)
}
  0x40   : > { %s2323_s29 = scalar_lea.vmem %s2597_s13, 128  ;;  %p2331_p0 = scmp.lt.s32.totalorder %s2597_s13, %s2597_s13 }
  0x41   : > { %p2324_p11 = scmp.ne.s32.totalorder %s2597_s13, %s2323_s29  ;;  %p2332_p2 = scmp.lt.s32.totalorder %s2323_s29, %s2323_s29 }
  0x43   : > { %p2326_p12 = pnand %p2324_p11, %p2284_p10  ;;  %p2333_p3 = por %p2332_p2, %p2331_p0 }
  0x45   : > { %p2327_p13 = pneg %p2326_p12 }
  0x47   : > { %p2334_p7 = pnand %p2333_p3, %p2327_p13 }
  0x49   : > { %2337 = shalt.err (!%p2334_p7)
}
  0x4a   : > { %2201 = dma.hbm_to_vmem [thread:$0]  (!%p2593_p8), %s3082_s5, 128, %s2597_s13, [#allocation11]  }
  0x4b   : > { %s3083_s18 = ssub.s32 %s2474_s24, %s2600_s15  ;;  %s84_s19 = sadd.s32 1, %s2470_s23 }
  0x4c   : > { %p82_p10 = scmp.eq.s32.totalorder %s3083_s18, 0  ;;  %p91_p9 = scmp.ne.s32.totalorder %s2470_s23, %s2466_s22 }
  0x4d   : > { %p92_p1 = scmp.eq.s32.totalorder %s2474_s24, 0  ;;  %p2211_p5 = scmp.lt.s32.totalorder %s2474_s24, 2 }
  0x4e   : > { %s2659_s14 = scalar_select %p82_p10, %s2470_s23, %s84_s19  }
  0x4f   : > { %p93_p4 = por %p92_p1, %p91_p9  ;;  %s389_s20 = sand.u32 1, %s2470_s23  }
  0x50   : > { %3084 = sst [smem:[#allocation20_spill]] %s2659_s14  ;;  %s1722_s21 = sshll.u32 %s2474_s24, 6 }
  0x51   : > { %s2664_s28 = sshll.u32 %s389_s20, 2  ;;  %s2669_s29 = scalar_lea.hbm %s3055_s2, %s1722_s21 }
  0x52   : > { %s393_s13 = scalar_lea.vmem [#allocation4], %s2664_s28  ;;  %p2672_p8 = pnand %p2211_p5, %p93_p4 }
  0x53   : > { %s400_s12 = sshll.u32 %s393_s13, 4  ;;  %s2681_s30 = scalar_lea.hbm %s3056_s3, %s1722_s21  ;;  %s2676_s12 = int_to_ptr.vmem [resolvable:$true] %s400_s12 }
  0x54   : > { %s390_s16 = scalar_lea.sflag [#allocation5], %s389_s20  ;;  %s2338_s4 = scalar_lea.hbm %s2669_s29, 64 }
  0x55   : > { %p2339_p6 = scmp.ne.s32.totalorder %s2669_s29, %s2338_s4  ;;  %p2340_p11 = pneg %p2672_p8 }
  0x56   : > { %s2343_s14 = scalar_lea.hbm %s3055_s2, 128  ;;  %p2344_p0 = scmp.lt.u32.totalorder %s2669_s29, %s3055_s2 }
  0x57   : > { %p2341_p12 = pnand %p2340_p11, %p2339_p6  ;;  %p2345_p2 = scmp.lt.u32.totalorder %s2343_s14, %s2338_s4 }
  0x58   : > { %p2347_p7 = scmp.lt.u32.totalorder %s2338_s4, %s2669_s29 }
  0x59   : > { %p2342_p13 = pneg %p2341_p12  ;;  %p2346_p3 = por %p2345_p2, %p2344_p0 }
  0x5b   : > { %p2348_p10 = por %p2347_p7, %p2346_p3 }
  0x5d   : > { %p2349_p9 = pnand %p2348_p10, %p2342_p13 }
  0x5f   : > { %2352 = shalt.err (!%p2349_p9)
}
  0x60   : > { %s2353_s20 = scalar_lea.vmem %s2676_s12, 64  ;;  %s2478_s5 = smov [#allocation4]  }
  0x61   : > { %p2354_p1 = scmp.ne.s32.totalorder %s2676_s12, %s2353_s20  ;;  %s2358_s21 = sshll.u32 %s2478_s5, 4  ;;  %s2359_s21 = int_to_ptr.vmem [resolvable:$false] %s2358_s21 }
  0x62   : > { %s2360_s23 = scalar_lea.vmem %s2359_s21, 128  ;;  %p2361_p6 = scmp.lt.s32.totalorder %s2676_s12, %s2359_s21 }
  0x63   : > { %p2356_p4 = pnand %p2354_p1, %p2340_p11  ;;  %p2362_p12 = scmp.lt.s32.totalorder %s2360_s23, %s2353_s20 }
  0x65   : > { %p2357_p5 = pneg %p2356_p4  ;;  %p2363_p0 = por %p2362_p12, %p2361_p6 }
  0x67   : > { %p2364_p2 = pnand %p2363_p0, %p2357_p5 }
  0x69   : > { %2367 = shalt.err (!%p2364_p2)
}
  0x6a   : > { %2205 = dma.hbm_to_vmem [thread:$0]  (!%p2672_p8), %s2669_s29, 64, %s2676_s12, %s390_s16  }
  0x6b   : > { %s407_s4 = sand.u32 1, %s2474_s24   ;;  %s411_s15 = scalar_lea.vmem [#allocation7], %s2664_s28 }
  0x6c   : > { %s418_s14 = sshll.u32 %s411_s15, 4  ;;  %s408_s18 = scalar_lea.sflag [#allocation8], %s407_s4  ;;  %s419_s14 = int_to_ptr.vmem [resolvable:$true] %s418_s14 }
  0x6d   : > { %s2368_s19 = scalar_lea.hbm %s2681_s30, 64  ;;  %s2373_s5 = scalar_lea.hbm %s3056_s3, 128 }
  0x6e   : > { %p2369_p13 = scmp.ne.s32.totalorder %s2681_s30, %s2368_s19  ;;  %p2374_p10 = scmp.lt.u32.totalorder %s2681_s30, %s3056_s3 }
  0x6f   : > { %p2375_p9 = scmp.lt.u32.totalorder %s2373_s5, %s2368_s19  ;;  %p2377_p4 = scmp.lt.u32.totalorder %s2368_s19, %s2681_s30 }
  0x70   : > { %p2371_p3 = pnand %p2369_p13, %p2340_p11 }
  0x71   : > { %p2376_p1 = por %p2375_p9, %p2374_p10 }
  0x72   : > { %p2372_p7 = pneg %p2371_p3 }
  0x73   : > { %p2378_p5 = por %p2377_p4, %p2376_p1 }
  0x75   : > { %p2379_p6 = pnand %p2378_p5, %p2372_p7 }
  0x77   : > { %2382 = shalt.err (!%p2379_p6)
}
  0x78   : > { %s2383_s24 = scalar_lea.vmem %s419_s14, 64  ;;  %s2479_s28 = smov [#allocation7]  }
  0x79   : > { %p2384_p12 = scmp.ne.s32.totalorder %s419_s14, %s2383_s24  ;;  %s2388_s29 = sshll.u32 %s2479_s28, 4  ;;  %s2389_s29 = int_to_ptr.vmem [resolvable:$false] %s2388_s29 }
  0x7a   : > { %s2390_s12 = scalar_lea.vmem %s2389_s29, 128  ;;  %p2391_p13 = scmp.lt.s32.totalorder %s419_s14, %s2389_s29 }
  0x7b   : > { %p2386_p0 = pnand %p2384_p12, %p2340_p11  ;;  %p2392_p3 = scmp.lt.s32.totalorder %s2390_s12, %s2383_s24 }
  0x7d   : > { %p2387_p2 = pneg %p2386_p0  ;;  %p2393_p9 = por %p2392_p3, %p2391_p13 }
  0x7f   : > { %p2394_p10 = pnand %p2393_p9, %p2387_p2 }
  0x81   : > { %2397 = shalt.err (!%p2394_p10)
}
  0x82   : > { %2208 = dma.hbm_to_vmem [thread:$0]  (!%p2672_p8), %s2681_s30, 64, %s419_s14, %s408_s18  }
  0x83   : > { %p3086_p7 = scmp.ne.s32.totalorder %s3078_s27, 0 }
  0x84   : > { %s429_s16 = sand.u32 (!%p3086_p7), 1, %s2466_s22   ;;  %p3087_p11 = scmp.ne.s32.totalorder (!%p3086_p7), %s3077_s26, 0 }
  0x85   : > { %427 = sbr.rel (%p3086_p7) target bundleno = 1374 (0x55e), region = 68  ;;  %s2732_s4 = sshll.u32 (!%p3086_p7), %s429_s16, 2 }
  0x86   : > { %s430_s15 = scalar_lea.sflag (!%p3086_p7), [#allocation5], %s429_s16  ;;  %s433_s19 = scalar_lea.vmem (!%p3086_p7), [#allocation4], %s2732_s4 }
  0x8c   : > { %2441 = dma.done.wait (%p3087_p11), %s430_s15, 64  }
  0x8d   : > { %2443 = vsyncadd (%p3087_p11), %s430_s15, 4294967232  ;;  %s438_s17 = sand.u32 1, %s2572_s25   ;;  %s442_s27 = scalar_lea.vmem [#allocation7], %s2732_s4 }
  0x8e   : > { %s439_s30 = scalar_lea.sflag [#allocation8], %s438_s17 }
  0x8f   : > { %2445 = dma.done.wait (%p3087_p11), %s439_s30, 64  }
  0x90   : > { %2447 = vsyncadd (%p3087_p11), %s439_s30, 4294967232  ;;  %p3088_p8 = scmp.eq.s32.totalorder %s2572_s25, 0 }
  0x92   : > { %2449 = dma.done.wait (%p3088_p8), [#allocation8], 128   ;;  %p3089_p1 = pmov %p3088_p8 }
  0x94   : > { %2451 = vsyncadd (%p3089_p1), [#allocation8], 4294967168  ;;  %p3090_p4 = pmov %p3089_p1 }
  0x95   : > { %p3091_p5 = pmov %p3089_p1 }
  0x96   : > { %2453 = dma.done.wait (%p3090_p4), [#allocation11], 128  }
  0x97   : > { %2455 = vsyncadd (%p3091_p5), [#allocation11], 4294967168  ;;  %s1730_s14 = sshll.u32 %s2572_s25, 4  ;;  %p3092_p12 = scmp.ne.s32.totalorder %s2572_s25, 0 }
  0x98   : > { %p498_p6 = scmp.lt.s32.totalorder %s1730_s14, 31  ;;  %vm509_vm0 = vcmask (!%p3092_p12), 257024   ;;  %v2480_v0 = vmov (!%p3092_p12), 0.0  }
  0x99   : > { %508 = sbr.rel (%p3092_p12) target bundleno = 160 (0xa0), region = 88  ;;  %510 = vst.msk [vmem:[#allocation2] sm:$0xf] (!%p3092_p12), %vm509_vm0, %v2480_v0  ;;  %511 = vst.msk [vmem:[#allocation3] sm:$0xf] (!%p3092_p12), %vm509_vm0, %v2480_v0 }
  0x9a   : > { %s3100_s14 = smov (!%p498_p6, %s1730_s14), 31 }
  0x9b   : > { %s1794_s18 = sshll.u32 %s3100_s14, 3 }
  0x9c   : > { %s2757_s20 = scalar_lea.vmem %s3053_s0, %s1794_s18 }
  0xa0 PF: > { %v562_v1 = vld [vmem:[%s3054_s1 + $0x80] sm:$0xff]  ;;  %v563_v2 = vld [vmem:[%s3054_s1 + $0x88] sm:$0xff]  ;;  %v564_v6 = vld [vmem:[%s3054_s1 + $0x90] sm:$0xff]  ;;  %s1734_s26 = sshll.u32 %s2572_s25, 7  ;;  %vm773_vm1 = vcmask 64512   ;;  %vm2482_vm2 = vmmov 0  }
  0xa1   : > { %v546_v3 = vld [vmem:[%s3054_s1] sm:$0xff]  ;;  %v586_v4 = vpack.c.bf16 %v563_v2, %v562_v1  ;;  %v547_v5 = vld [vmem:[%s3054_s1 + $0x8] sm:$0xff]  ;;  %v565_v7 = vld [vmem:[%s3054_s1 + $0x98] sm:$0xff]  ;;  %s2844_s30 = scalar_lea.vmem %s3054_s1, %s1734_s26  ;;  %vm1272_vm3 = vcmask 257024   ;;  %p1784_p0 = scmp.ne.s32.totalorder %s2572_s25, 1 }
  0xa2   : > { %v578_v8 = vpack.c.bf16 %v547_v5, %v546_v3  ;;  %v587_v9 = vpack.c.bf16 %v565_v7, %v564_v6  ;;  %v548_v10 = vld [vmem:[%s3054_s1 + $0x10] sm:$0xff]  ;;  %v549_v11 = vld [vmem:[%s3054_s1 + $0x18] sm:$0xff]  ;;  %v566_v12 = vld [vmem:[%s3054_s1 + $0xa0] sm:$0xff]  ;;  %vm2485_vm4 = vmmov (!%p1784_p0), 0   ;;  %vm1362_vm5 = vcmask (!%p1784_p0), 261120  }
  0xa3   : > { %1795 = vmatprep.subr.bf16.mxu0 %v586_v4  ;;  %v567_v13 = vld [vmem:[%s3054_s1 + $0xa8] sm:$0xff]  ;;  %v579_v14 = vpack.c.bf16 %v549_v11, %v548_v10  ;;  %v550_v16 = vld [vmem:[%s3054_s1 + $0x20] sm:$0xff]  ;;  %v568_v18 = vld [vmem:[%s3054_s1 + $0xb0] sm:$0xff]  ;;  %vm1601_vm6 = vcmask (!%p1784_p0), 27648  }
  0xa4   : > { %1796 = vmatpush3.bf16.msra.mxu0 %v578_v8  ;;  %v588_v15 = vpack.c.bf16 %v567_v13, %v566_v12  ;;  %v551_v17 = vld [vmem:[%s3054_s1 + $0x28] sm:$0xff]  ;;  %v569_v19 = vld [vmem:[%s3054_s1 + $0xb8] sm:$0xff]  ;;  %v552_v22 = vld [vmem:[%s3054_s1 + $0x30] sm:$0xff] }
  0xa5   : > { %1797 = vmatprep.subr.bf16.mxu0 %v587_v9  ;;  %v580_v20 = vpack.c.bf16 %v551_v17, %v550_v16  ;;  %v589_v21 = vpack.c.bf16 %v569_v19, %v568_v18  ;;  %v553_v23 = vld [vmem:[%s3054_s1 + $0x38] sm:$0xff]  ;;  %v570_v24 = vld [vmem:[%s3054_s1 + $0xc0] sm:$0xff]  ;;  %v571_v25 = vld [vmem:[%s3054_s1 + $0xc8] sm:$0xff] }
  0xa6   : > { %v2260_v26 = vld [vmem:[%s2757_s20 + $0x4] ss:$8 sps:$4 sm:$0xff]   ;;  %v581_v27 = vpack.c.bf16 %v553_v23, %v552_v22  ;;  %v590_v29 = vpack.c.bf16 %v571_v25, %v570_v24  ;;  %v572_v31 = vld [vmem:[%s3054_s1 + $0xd0] sm:$0xff]  ;;  %v573_v32 = vld [vmem:[%s3054_s1 + $0xd8] sm:$0xff] }
  0xa7   : > { %v554_v28 = vld [vmem:[%s3054_s1 + $0x40] sm:$0xff]  ;;  %v555_v30 = vld [vmem:[%s3054_s1 + $0x48] sm:$0xff]  ;;  %706 = vmatprep.mubr.bf16.mxu0 %v2260_v26  ;;  %v556_v34 = vld [vmem:[%s3054_s1 + $0x50] sm:$0xff]  ;;  %v591_v35 = vpack.c.bf16 %v573_v32, %v572_v31 }
  0xa8   : > { %1798 = vmatpush3.bf16.msra.mxu0 %v579_v14  ;;  %v582_v33 = vpack.c.bf16 %v555_v30, %v554_v28  ;;  %v557_v36 = vld [vmem:[%s3054_s1 + $0x58] sm:$0xff]  ;;  %v574_v37 = vld [vmem:[%s3054_s1 + $0xe0] sm:$0xff]  ;;  %v575_v38 = vld [vmem:[%s3054_s1 + $0xe8] sm:$0xff] }
  0xa9   : > { %1799 = vmatprep.subr.bf16.mxu0 %v588_v15  ;;  %v558_v39 = vld [vmem:[%s3054_s1 + $0x60] sm:$0xff]  ;;  %v583_v40 = vpack.c.bf16 %v557_v36, %v556_v34  ;;  %v559_v41 = vld [vmem:[%s3054_s1 + $0x68] sm:$0xff]  ;;  %v592_v42 = vpack.c.bf16 %v575_v38, %v574_v37  ;;  %v576_v43 = vld [vmem:[%s3054_s1 + $0xf0] sm:$0xff] }
  0xaa   : > { %v772_v44 = vld [vmem:[#allocation10] sm:$0xff]  ;;  %v577_v46 = vld [vmem:[%s3054_s1 + $0xf8] sm:$0xff]  ;;  %v515_v47 = vld [vmem:[%s2844_s30 + $0x8] sm:$0xff]  ;;  %v584_v49 = vpack.c.bf16 %v559_v41, %v558_v39 }
  0xab   : > { %v514_v45 = vld [vmem:[%s2844_s30] sm:$0xff]  ;;  %1942 = vmatprep.subr.mxu1 %v772_v44  ;;  %v516_v48 = vld [vmem:[%s2844_s30 + $0x10] sm:$0xff]  ;;  %v593_v50 = vpack.c.bf16 %v577_v46, %v576_v43  ;;  %v561_v52 = vld [vmem:[%s3054_s1 + $0x78] sm:$0xff] }
  0xac   : > { %1800 = vmatpush3.bf16.msra.mxu0 %v580_v20  ;;  %1944 = vmatprep.mubr.msk.f32.mxu1 %vm773_vm1, %v514_v45  ;;  %v560_v51 = vld [vmem:[%s3054_s1 + $0x70] sm:$0xff]  ;;  %v517_v53 = vld [vmem:[%s2844_s30 + $0x18] sm:$0xff]  ;;  %v518_v54 = vld [vmem:[%s2844_s30 + $0x20] sm:$0xff] }
  0xad   : > { %1801 = vmatprep.subr.bf16.mxu0 %v589_v21  ;;  %1943 = vmatpush3.msra.mxu1 %v772_v44  ;;  %v585_v55 = vpack.c.bf16 %v561_v52, %v560_v51  ;;  %v519_v56 = vld [vmem:[%s2844_s30 + $0x28] sm:$0xff]  ;;  %v520_v57 = vld [vmem:[%s2844_s30 + $0x30] sm:$0xff]  ;;  %v521_v60 = vld [vmem:[%s2844_s30 + $0x38] sm:$0xff] }
  0xae   : > { %1945 = vmatmul.mubr.msk.f32.vlgmr.msra.gmra.mrb[0].mxu1 %vm773_vm1, %v515_v47  ;;  %v2258_v58 = vld [vmem:[%s2757_s20] ss:$8 sps:$4 sm:$0xff]   ;;  %v2261_v59 = vld [vmem:[%s2757_s20 + $0x14] ss:$8 sps:$4 sm:$0xff]   ;;  %v2263_v0 = vld [vmem:[%s2757_s20 + $0x10] ss:$8 sps:$4 sm:$0xff]  }
  0xaf   : > { %1947 = vmatprep.mubr.msk.f32.mxu1 %vm773_vm1, %v516_v48  ;;  %v522_v61 = vld [vmem:[%s2844_s30 + $0x40] sm:$0xff]  ;;  %v523_v62 = vld [vmem:[%s2844_s30 + $0x48] sm:$0xff]  ;;  %v524_v63 = vld [vmem:[%s2844_s30 + $0x50] sm:$0xff] }
  0xb0   : > { %1802 = vmatpush3.bf16.msra.mxu0 %v581_v27  ;;  %v2264_v1 = vld [vmem:[%s2757_s20 + $0x24] ss:$8 sps:$4 sm:$0xff]   ;;  %v525_v2 = vld [vmem:[%s2844_s30 + $0x58] sm:$0xff]  ;;  %v2266_v5 = vld [vmem:[%s2757_s20 + $0x20] ss:$8 sps:$4 sm:$0xff]  }
  0xb1   : > { %1803 = vmatprep.subr.bf16.mxu0 %v590_v29  ;;  %v526_v3 = vld [vmem:[%s2844_s30 + $0x60] sm:$0xff]  ;;  %v527_v4 = vld [vmem:[%s2844_s30 + $0x68] sm:$0xff]  ;;  %v2267_v6 = vld [vmem:[%s2757_s20 + $0x34] ss:$8 sps:$4 sm:$0xff]  }
  0xb2   : > { %1948 = vmatmul.mubr.msk.f32.gmra.mrb[2].mxu1 %vm773_vm1, %v517_v53  ;;  %v2269_v7 = vld [vmem:[%s2757_s20 + $0x30] ss:$8 sps:$4 sm:$0xff]   ;;  %v2270_v8 = vld [vmem:[%s2757_s20 + $0x44] ss:$8 sps:$4 sm:$0xff]   ;;  %v2272_v9 = vld [vmem:[%s2757_s20 + $0x40] ss:$8 sps:$4 sm:$0xff]  }
  0xb3   : > { %1950 = vmatprep.mubr.msk.f32.mxu1 %vm773_vm1, %v518_v54  ;;  %v2273_v10 = vld [vmem:[%s2757_s20 + $0x54] ss:$8 sps:$4 sm:$0xff]   ;;  %v2275_v11 = vld [vmem:[%s2757_s20 + $0x50] ss:$8 sps:$4 sm:$0xff]   ;;  %v2276_v12 = vld [vmem:[%s2757_s20 + $0x64] ss:$8 sps:$4 sm:$0xff]  }
  0xb4   : > { %1804 = vmatpush3.bf16.msra.mxu0 %v582_v33  ;;  %v2278_v13 = vld [vmem:[%s2757_s20 + $0x60] ss:$8 sps:$4 sm:$0xff]   ;;  %v2279_v14 = vld [vmem:[%s2757_s20 + $0x74] ss:$8 sps:$4 sm:$0xff]   ;;  %v2281_v15 = vld [vmem:[%s2757_s20 + $0x70] ss:$8 sps:$4 sm:$0xff]  }
  0xb5   : > { %1805 = vmatprep.subr.bf16.mxu0 %v591_v35  ;;  %v528_v16 = vld [vmem:[%s2844_s30 + $0x70] sm:$0xff]  ;;  %v529_v17 = vld [vmem:[%s2844_s30 + $0x78] sm:$0xff] }
  0xb6   : > { %1951 = vmatmul.mubr.msk.f32.gmra.mrb[4].mxu1 %vm773_vm1, %v519_v56  ;;  %v771_v18 = vld [vmem:[#allocation9] sm:$0xff] }
  0xb7   : > { %1953 = vmatprep.mubr.msk.f32.mxu1 %vm773_vm1, %v520_v57  ;;  %1968 = vmatprep.subr.mxu1 %v771_v18 }
  0xb8   : > { %1806 = vmatpush3.bf16.msra.mxu0 %v583_v40  ;;  %1969 = vmatpush3.msra.mxu1 %v771_v18 }
  0xb9   : > { %1807 = vmatprep.subr.bf16.mxu0 %v592_v42 }
  0xba   : > { %1954 = vmatmul.mubr.msk.f32.gmra.mrb[6].mxu1 %vm773_vm1, %v521_v60 }
  0xbb   : > { %1956 = vmatprep.mubr.msk.f32.mxu1 %vm773_vm1, %v522_v61 }
  0xbc   : > { %1808 = vmatpush3.bf16.msra.mxu0 %v584_v49 }
  0xbd   : > { %1809 = vmatprep.subr.bf16.mxu0 %v593_v50 }
  0xbe   : > { %1957 = vmatmul.mubr.msk.f32.gmra.mrb[8].mxu1 %vm773_vm1, %v523_v62 }
  0xbf   : > { %1959 = vmatprep.mubr.msk.f32.mxu1 %vm773_vm1, %v524_v63 }
  0xc0   : > { %1810 = vmatpush3.bf16.msra.mxu0 %v585_v55 }
  0xc2   : > { %1960 = vmatmul.mubr.msk.f32.gmra.mrb[10].mxu1 %vm773_vm1, %v525_v2 }
  0xc3   : > { %707 = vmatmul.mubr.bf16.vlgmr.msra.gmra.mrb[0].mxu0 %v2258_v58  ;;  %1962 = vmatprep.mubr.msk.f32.mxu1 %vm773_vm1, %v526_v3  ;;  %v2481_v3 = vmov 0.0|0.0  }
  0xc4   : > { %714 = vmatprep.mubr.bf16.mxu0 %v2261_v59  ;;  %2097 = vmatprep.subr.bf16.mxu1 %v2481_v3 }
  0xc5   : > { %2121 = vmatprep.subr.bf16.mxu0 %v2481_v3 }
  0xc6   : > { %1963 = vmatmul.mubr.msk.f32.gmra.mrb[12].mxu1 %vm773_vm1, %v527_v4  ;;  %v2483_v4 = vmov 0.0  }
  0xc7   : > { %1965 = vmatprep.mubr.msk.f32.mxu1 %vm773_vm1, %v528_v16 }
  0xca   : > { %1966 = vmatmul.mubr.msk.f32.gmra.mrb[14].mxu1 %vm773_vm1, %v529_v17 }
  0xcb   : > { %715 = vmatmul.mubr.bf16.gmra.mrb[4].mxu0 %v2263_v0 }
  0xcc   : > { %722 = vmatprep.mubr.bf16.mxu0 %v2264_v1 }
  0xd3   : > { %723 = vmatmul.mubr.bf16.gmra.mrb[8].mxu0 %v2266_v5  ;;  %v2932_v5 = vld [vmem:[%s3059_s6] ss:$0 sm:$0xff] }
  0xd4   : > { %730 = vmatprep.mubr.bf16.mxu0 %v2267_v6 }
  0xdb   : > { %731 = vmatmul.mubr.bf16.gmra.mrb[12].mxu0 %v2269_v7 }
  0xdc   : > { %738 = vmatprep.mubr.bf16.mxu0 %v2270_v8 }
  0xe3   : > { %739 = vmatmul.mubr.bf16.gmra.mrb[16].mxu0 %v2272_v9 }
  0xe4   : > { %746 = vmatprep.mubr.bf16.mxu0 %v2273_v10 }
  0xeb   : > { %747 = vmatmul.mubr.bf16.gmra.mrb[20].mxu0 %v2275_v11 }
  0xec   : > { %754 = vmatprep.mubr.bf16.mxu0 %v2276_v12 }
  0xf3   : > { %755 = vmatmul.mubr.bf16.gmra.mrb[24].mxu0 %v2278_v13 }
  0xf4   : > { %762 = vmatprep.mubr.bf16.mxu0 %v2279_v14 }
  0xfb   : > { %763 = vmatmul.mubr.bf16.gmra.mrb[28].mxu0 %v2281_v15 }
  0xfc   : > { %2061 = vmatprep.mubr.msk.f32.mxu0 %vm2482_vm2, %v2483_v4 }
 0x196   : > { %v1811_v19 = vpop.f32.mrb[0].mxu0 }
 0x197   : > { %v1812_v20 = vpop.f32.mrb[1].mxu0 }
 0x198   : > { %v1813_v21 = vadd.f32 %v1812_v20, %v1811_v19  ;;  %v1814_v22 = vpop.f32.mrb[2].mxu0 }
 0x199   : > { %v1815_v23 = vpop.f32.mrb[3].mxu0 }
 0x19a   : > { %v1816_v24 = vadd.f32 %v1815_v23, %v1814_v22  ;;  %1970 = vmatprep.mubr.msk.f32.mxu1 %vm773_vm1, %v1813_v21 }
 0x19c   : > { %1971 = vmatmul.mubr.msk.f32.vlgmr.msra.gmra.mrb[0].mxu1 %vm773_vm1, %v1816_v24 }
 0x19e   : > { %v1817_v25 = vpop.f32.mrb[4].mxu0 }
 0x19f   : > { %v1818_v26 = vpop.f32.mrb[5].mxu0 }
 0x1a0   : > { %v1819_v27 = vadd.f32 %v1818_v26, %v1817_v25  ;;  %v1820_v28 = vpop.f32.mrb[6].mxu0 }
 0x1a1   : > { %v1821_v29 = vpop.f32.mrb[7].mxu0 }
 0x1a2   : > { %v1822_v30 = vadd.f32 %v1821_v29, %v1820_v28  ;;  %1973 = vmatprep.mubr.msk.f32.mxu1 %vm773_vm1, %v1819_v27 }
 0x1a4   : > { %1974 = vmatmul.mubr.msk.f32.gmra.mrb[2].mxu1 %vm773_vm1, %v1822_v30 }
 0x1a6   : > { %v1823_v31 = vpop.f32.mrb[8].mxu0 }
 0x1a7   : > { %v1824_v32 = vpop.f32.mrb[9].mxu0 }
 0x1a8   : > { %v1825_v33 = vadd.f32 %v1824_v32, %v1823_v31  ;;  %v1826_v34 = vpop.f32.mrb[10].mxu0 }
 0x1a9   : > { %v1827_v35 = vpop.f32.mrb[11].mxu0 }
 0x1aa   : > { %v1828_v36 = vadd.f32 %v1827_v35, %v1826_v34  ;;  %1976 = vmatprep.mubr.msk.f32.mxu1 %vm773_vm1, %v1825_v33 }
 0x1ac   : > { %1977 = vmatmul.mubr.msk.f32.gmra.mrb[4].mxu1 %vm773_vm1, %v1828_v36 }
 0x1ae   : > { %v1829_v37 = vpop.f32.mrb[12].mxu0 }
 0x1af   : > { %v1830_v38 = vpop.f32.mrb[13].mxu0 }
 0x1b0   : > { %v1831_v39 = vadd.f32 %v1830_v38, %v1829_v37  ;;  %v1832_v40 = vpop.f32.mrb[14].mxu0 }
 0x1b1   : > { %v1833_v41 = vpop.f32.mrb[15].mxu0 }
 0x1b2   : > { %v1834_v42 = vadd.f32 %v1833_v41, %v1832_v40  ;;  %1979 = vmatprep.mubr.msk.f32.mxu1 %vm773_vm1, %v1831_v39 }
 0x1b4   : > { %1980 = vmatmul.mubr.msk.f32.gmra.mrb[6].mxu1 %vm773_vm1, %v1834_v42 }
 0x1b6   : > { %v1835_v43 = vpop.f32.mrb[16].mxu0 }
 0x1b7   : > { %v1836_v44 = vpop.f32.mrb[17].mxu0 }
 0x1b8   : > { %v1837_v45 = vadd.f32 %v1836_v44, %v1835_v43  ;;  %v1838_v46 = vpop.f32.mrb[18].mxu0 }
 0x1b9   : > { %v1839_v47 = vpop.f32.mrb[19].mxu0 }
 0x1ba   : > { %v1840_v48 = vadd.f32 %v1839_v47, %v1838_v46  ;;  %1982 = vmatprep.mubr.msk.f32.mxu1 %vm773_vm1, %v1837_v45 }
 0x1bc   : > { %1983 = vmatmul.mubr.msk.f32.gmra.mrb[8].mxu1 %vm773_vm1, %v1840_v48 }
 0x1be   : > { %v1841_v49 = vpop.f32.mrb[20].mxu0 }
 0x1bf   : > { %v1842_v50 = vpop.f32.mrb[21].mxu0 }
 0x1c0   : > { %v1843_v51 = vadd.f32 %v1842_v50, %v1841_v49  ;;  %v1844_v52 = vpop.f32.mrb[22].mxu0 }
 0x1c1   : > { %v1845_v53 = vpop.f32.mrb[23].mxu0 }
 0x1c2   : > { %v1846_v54 = vadd.f32 %v1845_v53, %v1844_v52  ;;  %1985 = vmatprep.mubr.msk.f32.mxu1 %vm773_vm1, %v1843_v51 }
 0x1c4   : > { %1986 = vmatmul.mubr.msk.f32.gmra.mrb[10].mxu1 %vm773_vm1, %v1846_v54 }
 0x1c6   : > { %v1847_v55 = vpop.f32.mrb[24].mxu0 }
 0x1c7   : > { %v1848_v56 = vpop.f32.mrb[25].mxu0 }
 0x1c8   : > { %v1849_v57 = vadd.f32 %v1848_v56, %v1847_v55  ;;  %v1850_v58 = vpop.f32.mrb[26].mxu0 }
 0x1c9   : > { %v1851_v59 = vpop.f32.mrb[27].mxu0 }
 0x1ca   : > { %v1852_v60 = vadd.f32 %v1851_v59, %v1850_v58  ;;  %1988 = vmatprep.mubr.msk.f32.mxu1 %vm773_vm1, %v1849_v57 }
 0x1cc   : > { %1989 = vmatmul.mubr.msk.f32.gmra.mrb[12].mxu1 %vm773_vm1, %v1852_v60 }
 0x1ce   : > { %v1853_v61 = vpop.f32.mrb[28].mxu0 }
 0x1cf   : > { %v1854_v62 = vpop.f32.mrb[29].mxu0 }
 0x1d0   : > { %v1855_v63 = vadd.f32 %v1854_v62, %v1853_v61  ;;  %v1856_v0 = vpop.f32.mrb[30].mxu0  ;;  %v1200_v62 = vld [vmem:[%s433_s19] sm:$0xf] }
 0x1d1   : > { %v1857_v1 = vpop.f32.mrb[31].mxu0 }
 0x1d2   : > { %v1858_v2 = vadd.f32 %v1857_v1, %v1856_v0  ;;  %1991 = vmatprep.mubr.msk.f32.mxu1 %vm773_vm1, %v1855_v63  ;;  %v1275_v63 = vld [vmem:[%s442_s27] sm:$0xf]  ;;  %v1199_v0 = vld [vmem:[#allocation2] sm:$0xf]  ;;  %v1274_v1 = vld [vmem:[#allocation3] sm:$0xf] }
 0x1d4   : > { %1992 = vmatmul.mubr.msk.f32.gmra.mrb[14].mxu1 %vm773_vm1, %v1858_v2 }
 0x1d5   : > { %2026 = vmatprep.mubr.msk.f32.mxu1 %vm2482_vm2, %v2483_v4 }
 0x26f   : > { %v1972_v6 = vpop.f32.mrb[0].mxu1 }
 0x270   : > { %v1168_v7 = vadd.f32 %v1972_v6, %v2932_v5  ;;  %v1081_v8 = vpop.f32.mrb[1].mxu1 }
 0x271   : > { %v1167_v9 = vadd.f32 %v2932_v5, %v1081_v8  ;;  %v1358_v8 = vld [vmem:[%s3061_s8] sm:$0xff] (!%p1784_p0) }
 0x272   : > { %v1184_v10 = vmax.f32 %v1168_v7, 0.0 }
 0x273   : > { %v1183_v11 = vmax.f32 %v1167_v9, 0.0  ;;  %v1359_v9 = vld [vmem:[%s3061_s8 + $0x8] sm:$0xff] (!%p1784_p0) }
 0x275   : > { %v2098_v12 = vpack.c.bf16 %v1184_v10, %v1183_v11  ;;  %v1353_v10 = vld [vmem:[%s3060_s7] sm:$0xff] (!%p1784_p0)  ;;  %v2484_v11 = vmov (!%p1784_p0), 0.0|0.0  }
 0x277   : > { %v1975_v13 = vpop.f32.mrb[2].mxu1  ;;  %2099 = vmatpush3.bf16.msra.mxu1 %v2098_v12  ;;  %2123 = vmatpush3.bf16.msra.mxu0 %v2098_v12  ;;  %v2146_v12 = vpack.c.bf16 (!%p1784_p0), %v1359_v9, %v1358_v8 }
 0x278   : > { %v1170_v14 = vadd.f32 %v1975_v13, %v2932_v5  ;;  %v1091_v15 = vpop.f32.mrb[3].mxu1  ;;  %2100 = vmatprep.subr.bf16.mxu1 %v2481_v3  ;;  %2124 = vmatprep.subr.bf16.mxu0 %v2481_v3  ;;  %v1354_v13 = vld [vmem:[%s3060_s7 + $0x8] sm:$0xff] (!%p1784_p0) }
 0x279   : > { %v1169_v16 = vadd.f32 %v2932_v5, %v1091_v15  ;;  %v1361_v15 = vld [vmem:[%s3061_s8 + $0x18] sm:$0xff] (!%p1784_p0) }
 0x27a   : > { %v1186_v17 = vmax.f32 %v1170_v14, 0.0  ;;  %v1360_v14 = vld [vmem:[%s3061_s8 + $0x10] sm:$0xff] (!%p1784_p0) }
 0x27b   : > { %v1185_v18 = vmax.f32 %v1169_v16, 0.0  ;;  %v2152_v16 = vpack.c.bf16 (!%p1784_p0), %v1354_v13, %v1353_v10 }
 0x27d   : > { %v2101_v19 = vpack.c.bf16 %v1186_v17, %v1185_v18  ;;  %v1355_v17 = vld [vmem:[%s3060_s7 + $0x10] sm:$0xff] (!%p1784_p0)  ;;  %v1356_v18 = vld [vmem:[%s3060_s7 + $0x18] sm:$0xff] (!%p1784_p0) }
 0x27f   : > { %v1978_v20 = vpop.f32.mrb[4].mxu1  ;;  %2102 = vmatpush3.bf16.msra.mxu1 %v2101_v19  ;;  %2126 = vmatpush3.bf16.msra.mxu0 %v2101_v19  ;;  %v2486_v19 = vmov (!%p1784_p0), 0.0  }
 0x280   : > { %v1172_v21 = vadd.f32 %v1978_v20, %v2932_v5  ;;  %v1101_v22 = vpop.f32.mrb[5].mxu1  ;;  %2103 = vmatprep.subr.bf16.mxu1 %v2481_v3  ;;  %2127 = vmatprep.subr.bf16.mxu0 %v2481_v3  ;;  %v2149_v20 = vpack.c.bf16 (!%p1784_p0), %v1361_v15, %v1360_v14 }
 0x281   : > { %v1171_v23 = vadd.f32 %v2932_v5, %v1101_v22  ;;  %v1517_v22 = vld [vmem:[%s3063_s10] sm:$0xff] (!%p1784_p0) }
 0x282   : > { %v1188_v24 = vmax.f32 %v1172_v21, 0.0  ;;  %v2155_v21 = vpack.c.bf16 (!%p1784_p0), %v1356_v18, %v1355_v17 }
 0x283   : > { %v1187_v25 = vmax.f32 %v1171_v23, 0.0  ;;  %v1518_v23 = vld [vmem:[%s3063_s10 + $0x8] sm:$0xff] (!%p1784_p0) }
 0x285   : > { %v2104_v26 = vpack.c.bf16 %v1188_v24, %v1187_v25  ;;  %v2158_v25 = vpack.c.bf16 (!%p1784_p0), %v1518_v23, %v1517_v22 }
 0x287   : > { %v1981_v27 = vpop.f32.mrb[6].mxu1  ;;  %2105 = vmatpush3.bf16.msra.mxu1 %v2104_v26  ;;  %2129 = vmatpush3.bf16.msra.mxu0 %v2104_v26 }
 0x288   : > { %v1174_v28 = vadd.f32 %v1981_v27, %v2932_v5  ;;  %v1111_v29 = vpop.f32.mrb[7].mxu1  ;;  %2106 = vmatprep.subr.bf16.mxu1 %v2481_v3  ;;  %2130 = vmatprep.subr.bf16.mxu0 %v2481_v3  ;;  %v1519_v27 = vld [vmem:[%s3063_s10 + $0x10] sm:$0xff] (!%p1784_p0) }
 0x289   : > { %v1173_v30 = vadd.f32 %v2932_v5, %v1111_v29 }
 0x28a   : > { %v1190_v31 = vmax.f32 %v1174_v28, 0.0  ;;  %v1520_v28 = vld [vmem:[%s3063_s10 + $0x18] sm:$0xff] (!%p1784_p0) }
 0x28b   : > { %v1189_v32 = vmax.f32 %v1173_v30, 0.0  ;;  %v2161_v29 = vpack.c.bf16 (!%p1784_p0), %v1520_v28, %v1519_v27 }
 0x28d   : > { %v2107_v33 = vpack.c.bf16 %v1190_v31, %v1189_v32  ;;  %v1787_v32 = vld [vmem:[%s3062_s9] ss:$0 sm:$0xff] (!%p1784_p0) }
 0x28f   : > { %v1984_v34 = vpop.f32.mrb[8].mxu1  ;;  %2108 = vmatpush3.bf16.msra.mxu1 %v2107_v33  ;;  %2132 = vmatpush3.bf16.msra.mxu0 %v2107_v33 }
 0x290   : > { %v1176_v35 = vadd.f32 %v1984_v34, %v2932_v5  ;;  %v1121_v36 = vpop.f32.mrb[9].mxu1  ;;  %2109 = vmatprep.subr.bf16.mxu1 %v2481_v3  ;;  %2133 = vmatprep.subr.bf16.mxu0 %v2481_v3 }
 0x291   : > { %v1175_v37 = vadd.f32 %v2932_v5, %v1121_v36 }
 0x292   : > { %v1192_v38 = vmax.f32 %v1176_v35, 0.0 }
 0x293   : > { %v1191_v39 = vmax.f32 %v1175_v37, 0.0  ;;  %v1788_v37 = vld [vmem:[%s3064_s11] ss:$0 sm:$0xff] (!%p1784_p0) }
 0x295   : > { %v2110_v40 = vpack.c.bf16 %v1192_v38, %v1191_v39 }
 0x297   : > { %v1987_v41 = vpop.f32.mrb[10].mxu1  ;;  %2111 = vmatpush3.bf16.msra.mxu1 %v2110_v40  ;;  %2135 = vmatpush3.bf16.msra.mxu0 %v2110_v40 }
 0x298   : > { %v1178_v42 = vadd.f32 %v1987_v41, %v2932_v5  ;;  %v1131_v43 = vpop.f32.mrb[11].mxu1  ;;  %2112 = vmatprep.subr.bf16.mxu1 %v2481_v3  ;;  %2136 = vmatprep.subr.bf16.mxu0 %v2481_v3 }
 0x299   : > { %v1177_v44 = vadd.f32 %v2932_v5, %v1131_v43 }
 0x29a   : > { %v1194_v45 = vmax.f32 %v1178_v42, 0.0 }
 0x29b   : > { %v1193_v46 = vmax.f32 %v1177_v44, 0.0 }
 0x29d   : > { %v2113_v47 = vpack.c.bf16 %v1194_v45, %v1193_v46 }
 0x29f   : > { %v1990_v48 = vpop.f32.mrb[12].mxu1  ;;  %2114 = vmatpush3.bf16.msra.mxu1 %v2113_v47  ;;  %2138 = vmatpush3.bf16.msra.mxu0 %v2113_v47 }
 0x2a0   : > { %v1180_v49 = vadd.f32 %v1990_v48, %v2932_v5  ;;  %v1141_v50 = vpop.f32.mrb[13].mxu1  ;;  %2115 = vmatprep.subr.bf16.mxu1 %v2481_v3  ;;  %2139 = vmatprep.subr.bf16.mxu0 %v2481_v3 }
 0x2a1   : > { %v1179_v51 = vadd.f32 %v2932_v5, %v1141_v50 }
 0x2a2   : > { %v1196_v52 = vmax.f32 %v1180_v49, 0.0 }
 0x2a3   : > { %v1195_v53 = vmax.f32 %v1179_v51, 0.0 }
 0x2a5   : > { %v2116_v54 = vpack.c.bf16 %v1196_v52, %v1195_v53 }
 0x2a7   : > { %v1993_v55 = vpop.f32.mrb[14].mxu1  ;;  %2117 = vmatpush3.bf16.msra.mxu1 %v2116_v54  ;;  %2141 = vmatpush3.bf16.msra.mxu0 %v2116_v54 }
 0x2a8   : > { %v1182_v56 = vadd.f32 %v1993_v55, %v2932_v5  ;;  %v1151_v57 = vpop.f32.mrb[15].mxu1  ;;  %2118 = vmatprep.subr.bf16.mxu1 %v2481_v3  ;;  %2142 = vmatprep.subr.bf16.mxu0 %v2481_v3 }
 0x2a9   : > { %v1181_v58 = vadd.f32 %v2932_v5, %v1151_v57 }
 0x2aa   : > { %v1198_v59 = vmax.f32 %v1182_v56, 0.0 }
 0x2ab   : > { %v1197_v60 = vmax.f32 %v1181_v58, 0.0 }
 0x2ad   : > { %v2119_v61 = vpack.c.bf16 %v1198_v59, %v1197_v60 }
 0x2af   : > { %2120 = vmatpush3.bf16.msra.mxu1 %v2119_v61  ;;  %2144 = vmatpush3.bf16.msra.mxu0 %v2119_v61 }
 0x2b0   : > { %2145 = vmatprep.subr.bf16.mxu0 (!%p1784_p0), %v2484_v11  ;;  %2151 = vmatprep.subr.bf16.mxu1 (!%p1784_p0), %v2484_v11 }
 0x2b2   : > { %2027 = vmatmul.mubr.f32.vlgmr.msra.gmra.mrb[16].mxu1 %v1200_v62  ;;  %2062 = vmatmul.mubr.f32.vlgmr.msra.gmra.mrb[32].mxu0 %v1275_v63 }
 0x2b3   : > { %2072 = vmatprep.mubr.msk.f32.mxu0 (!%p1784_p0), %vm2485_vm4, %v2486_v19  ;;  %2083 = vmatprep.mubr.msk.f32.mxu1 (!%p1784_p0), %vm2485_vm4, %v2486_v19 }
 0x2b4   : > { %2147 = vmatpush3.bf16.msra.mxu0 (!%p1784_p0), %v2146_v12  ;;  %2153 = vmatpush3.bf16.msra.mxu1 (!%p1784_p0), %v2152_v16 }
 0x2b5   : > { %2148 = vmatprep.subr.bf16.mxu0 (!%p1784_p0), %v2484_v11  ;;  %2154 = vmatprep.subr.bf16.mxu1 (!%p1784_p0), %v2484_v11 }
 0x2b8   : > { %2150 = vmatpush3.bf16.msra.mxu0 (!%p1784_p0), %v2149_v20  ;;  %2156 = vmatpush3.bf16.msra.mxu1 (!%p1784_p0), %v2155_v21 }
 0x2b9   : > { %2157 = vmatprep.subr.bf16.mxu0 (!%p1784_p0), %v2484_v11 }
 0x382   : > { %1351 = sbr.rel (%p1784_p0) target bundleno = 1343 (0x53f), region = 92 }
 0x385   : > { %v1267_v2 = vpop.f32.mrb[16].mxu1  ;;  %v1342_v4 = vpop.f32.mrb[32].mxu0 }
 0x386   : > { %v1271_v6 = vadd.f32 %v1267_v2, %v1199_v0  ;;  %v1346_v3 = vadd.f32 %v1342_v4, %v1274_v1  ;;  %v2028_v7 = vpop.f32.mrb[17].mxu1  ;;  %v2063_v5 = vpop.f32.mrb[33].mxu0 }
 0x388   : > { %1273 = vst.msk [vmem:[#allocation2] sm:$0xf] %vm1272_vm3, %v1271_v6  ;;  %1347 = vst.msk [vmem:[#allocation3] sm:$0xf] %vm1272_vm3, %v1346_v3 }
 0x38f   : > { %v1357_v24 = vld [vmem:[#allocation3] sm:$0xf]  ;;  %v1352_v26 = vld [vmem:[#allocation2] sm:$0xf] }
 0x390   : > { %2073 = vmatmul.mubr.msk.f32.vlgmr.msra.gmra.mrb[0].mxu0 %vm1362_vm5, %v1357_v24  ;;  %2084 = vmatmul.mubr.msk.f32.vlgmr.msra.gmra.mrb[0].mxu1 %vm1362_vm5, %v1352_v26 }
 0x391   : > { %2159 = vmatpush3.bf16.msra.mxu0 %v2158_v25  ;;  %2094 = vmatprep.mubr.msk.f32.mxu0 %vm2485_vm4, %v2486_v19 }
 0x392   : > { %2160 = vmatprep.subr.bf16.mxu0 %v2484_v11 }
 0x395   : > { %2162 = vmatpush3.bf16.msra.mxu0 %v2161_v29 }
 0x463   : > { %v1432_v30 = vpop.f32.mrb[0].mxu0  ;;  %v1505_v31 = vpop.f32.mrb[0].mxu1 }
 0x464   : > { %v2074_v33 = vpop.f32.mrb[1].mxu0  ;;  %v1506_v34 = vadd.f32 %v1505_v31, %v1432_v30  ;;  %v2085_v35 = vpop.f32.mrb[1].mxu1 }
 0x466   : > { %v1516_v36 = vadd.f32 %v1787_v32, %v1506_v34 }
 0x468   : > { %2095 = vmatmul.mubr.msk.f32.vlgmr.msra.gmra.mrb[2].mxu0 %vm1362_vm5, %v1516_v36 }
 0x53b   : > { %v1597_v38 = vpop.f32.mrb[2].mxu0 }
 0x53c   : > { %v1598_v39 = vadd.f32 %v1788_v37, %v1597_v38  ;;  %v2096_v40 = vpop.f32.mrb[3].mxu0 }
 0x53e   : > { %1602 = vst.msk [vmem:[#allocation12] sm:$0xf] %vm1601_vm6, %v1598_v39 }
 0x53f PF: > { %p2214_p2 = scmp.eq.s32.totalorder %s2572_s25, 1  ;;  %s2487_s21 = smov [#allocation12]  }
 0x540   : > { %s1610_s23 = sshll.u32 %s2487_s21, 4  ;;  %s1611_s23 = int_to_ptr.vmem [resolvable:$true] %s1610_s23 }
 0x541   : > { %s2398_s26 = scalar_lea.vmem %s1611_s23, 64  ;;  %p2405_p10 = scmp.lt.s32.totalorder %s1611_s23, %s1611_s23 }
 0x542   : > { %p2399_p13 = scmp.ne.s32.totalorder %s1611_s23, %s2398_s26  ;;  %p2406_p7 = scmp.lt.s32.totalorder %s2398_s26, %s2398_s26 }
 0x544   : > { %p2400_p3 = pnand %p2399_p13, %p2214_p2  ;;  %p2407_p11 = por %p2406_p7, %p2405_p10 }
 0x546   : > { %p2401_p9 = pneg %p2400_p3 }
 0x548   : > { %p2408_p8 = pnand %p2407_p11, %p2401_p9 }
 0x54a   : > { %2411 = shalt.err (!%p2408_p8)
}
 0x54b   : > { %s3093_s29 = sld [smem:[#allocation23_spill]] }
 0x551   : > { %s2412_s12 = scalar_lea.hbm %s3093_s29, 64 }
 0x552   : > { %p2413_p1 = scmp.ne.s32.totalorder %s3093_s29, %s2412_s12  ;;  %p2418_p6 = scmp.lt.u32.totalorder %s2412_s12, %s3093_s29 }
 0x554   : > { %p2414_p4 = pnand %p2413_p1, %p2214_p2 }
 0x556   : > { %p2415_p5 = pneg %p2414_p4 }
 0x558   : > { %p2420_p12 = pnand %p2418_p6, %p2415_p5 }
 0x55a   : > { %2423 = shalt.err (!%p2420_p12)
}
 0x55b   : > { %2192 = dma.vmem_to_hbm [thread:$0]  (%p2214_p2), %s1611_s23, 64, %s3093_s29, [#allocation6]  }
 0x55c   : > { %2457 = dma.done.wait (%p2214_p2), [#allocation6], 64  }
 0x55d   : > { %2459 = vsyncadd (%p2214_p2), [#allocation6], 4294967232 }
 0x55e PF: > { %s3094_s24 = sld [smem:[#allocation19_spill]]  ;;  %s3095_s27 = sld [smem:[#allocation18_spill]] }
 0x55f   : > { %s3096_s23 = sld [smem:[#allocation20_spill]]  ;;  %s3097_s21 = smov %s2466_s22 }
 0x564   : > { %p27_p0 = scmp.ge.s32.totalorder %s3094_s24, 4   ;;  %s3098_s22 = smov %s3095_s27 }
 0x566   :  { %29 = sbr.rel (!%p27_p0) target bundleno = 11 (0xb), region = 138 }
 0x56d   :  { %1623 = vsyncpa [#allocation5], 1 }
 0x56e   :  { %1625 = vsyncpa [#allocation5 + $0x1], 1 }
 0x56f   :  { %1626 = vsyncpa [#allocation8], 1 }
 0x570   :  { %1628 = vsyncpa [#allocation8 + $0x1], 1 }
 0x571   :  { %1629 = vsyncpa [#allocation11], 1 }
 0x572   :  { %1630 = vsyncpa [#allocation6], 1 }
 0x573   :  { %1632 = vsyncpa [#allocation6 + $0x1], 1 }

</bundles_post_ra>
